<compile_context>
chip_gen: v7x
topology: tpu7x:2x2x1
jax: 0.10.0
libtpu: 0.0.40
codegen_flags: <defaults>
</compile_context>

<pallas_src>
import jax
import jax.numpy as jnp
from jax.experimental import pallas as pl
from jax.experimental.pallas import tpu as pltpu

NEG_SLOPE = 0.01                      # nn.LeakyReLU default negative_slope
TM_TARGET = 8192                      # rows per tile (multiple of 8 and 128)
VMEM_LIMIT_BYTES = 32 * 1024 * 1024   # explicit scoped-VMEM limit (v5e default is 16 MiB)

# Contract lhs dim 1 with rhs dim 1  (A @ B^T) -- keeps samples on the lane axis.
_NT_DIMS = (((1,), (1,)), ((), ()))


def alpha_kernel(e_ref, w1_ref, b1_ref, wout_t_ref, bout_t_ref, out_ref):
    """e_ref: (rows, F) f32; out_ref: (2, rows) f32 (row 0 = mu, row 1 = sigma)."""
    # h = leaky_relu(e @ W1 + b1)                          (rows, H), f32
    h = jnp.dot(e_ref[...], w1_ref[...], preferred_element_type=jnp.float32)
    h = h + b1_ref[...]
    h = jnp.maximum(h, NEG_SLOPE * h)                      # leaky relu: mul + max

    # Fused heads, transposed: (2, H) . (rows, H)^T -> (2, rows); samples on lanes.
    z_t = jax.lax.dot_general(wout_t_ref[...], h,
                              dimension_numbers=_NT_DIMS,
                              preferred_element_type=jnp.float32)
    z_t = z_t + bout_t_ref[...]                            # (2, 1) lane-broadcast bias

    # Row 0 -> mu (identity); row 1 -> sigma = softplus = logaddexp(x, 0) (stable).
    row = jax.lax.broadcasted_iota(jnp.int32, z_t.shape, 0)
    out_ref[...] = jnp.where(row == 0, z_t, jnp.logaddexp(z_t, 0.0))


def _round_up(x, m):
    return (x + m - 1) // m * m


def _pick_tile(rows):
    """Rows per tile: whole extent when small; otherwise a multiple of 128 (lane
    alignment of the transposed output + sublane alignment of e), sized so the
    grid has >= 2 steps for v7x's two TensorCores."""
    if rows <= 256:
        return rows
    if rows >= 2 * TM_TARGET:
        return TM_TARGET
    return min(TM_TARGET, _round_up(pl.cdiv(rows, 2), 128))


def _call_flat(e2d, w1, b1_2d, wout_t, bout_t):
    """Flattened (N, F) path (used when the reshape is layout-preserving)."""
    N, F = e2d.shape
    H = w1.shape[1]
    tm = _pick_tile(N)
    grid = (pl.cdiv(N, tm),)
    return pl.pallas_call(
        alpha_kernel,
        grid=grid,
        in_specs=[
            pl.BlockSpec((tm, F), lambda i: (i, 0)),     # e rows streamed over grid
            pl.BlockSpec((F, H), lambda i: (0, 0)),      # weights stay VMEM-resident
            pl.BlockSpec((1, H), lambda i: (0, 0)),
            pl.BlockSpec((2, H), lambda i: (0, 0)),
            pl.BlockSpec((2, 1), lambda i: (0, 0)),
        ],
        out_specs=pl.BlockSpec((2, tm), lambda i: (0, i)),   # lane-dense fused output
        out_shape=jax.ShapeDtypeStruct((2, N), jnp.float32),
        compiler_params=pltpu.CompilerParams(
            dimension_semantics=("parallel",),
            vmem_limit_bytes=VMEM_LIMIT_BYTES,
        ),
    )(e2d, w1, b1_2d, wout_t, bout_t)                       # (2, N)


def _call_3d(e, w1, b1_2d, wout_t, bout_t):
    """3-D path: index (B, Ns, F) directly (avoids a relayout copy when Ns % 8 != 0)."""
    B, Ns, F = e.shape
    H = w1.shape[1]
    tn = _pick_tile(Ns)
    grid = (B, pl.cdiv(Ns, tn))
    return pl.pallas_call(
        alpha_kernel,
        grid=grid,
        in_specs=[
            pl.BlockSpec((pl.Squeezed(), tn, F), lambda b, i: (b, i, 0)),
            pl.BlockSpec((F, H), lambda b, i: (0, 0)),
            pl.BlockSpec((1, H), lambda b, i: (0, 0)),
            pl.BlockSpec((2, H), lambda b, i: (0, 0)),
            pl.BlockSpec((2, 1), lambda b, i: (0, 0)),
        ],
        out_specs=pl.BlockSpec((pl.Squeezed(), 2, tn), lambda b, i: (b, 0, i)),
        out_shape=jax.ShapeDtypeStruct((B, 2, Ns), jnp.float32),
        compiler_params=pltpu.CompilerParams(
            dimension_semantics=("parallel", "parallel"),
            vmem_limit_bytes=VMEM_LIMIT_BYTES,
        ),
    )(e, w1, b1_2d, wout_t, bout_t)                         # (B, 2, Ns)


@jax.jit
def alpha_layer(e, w1, b1, w2, b2, w3, b3):
    """e: (B, Ns, F) float. Returns (mu, sigma), each (B, Ns) float32."""
    B, Ns, F = e.shape
    H = w1.shape[1]

    e = e.astype(jnp.float32)
    w1_f = w1.astype(jnp.float32)
    b1_2d = b1.reshape(1, H).astype(jnp.float32)
    wout_t = jnp.concatenate([w2, w3], axis=1).T.astype(jnp.float32)       # (2, H)
    bout_t = jnp.concatenate([b2, b3], axis=0).reshape(2, 1).astype(jnp.float32)

    if Ns % 8 == 0:
        out = _call_flat(e.reshape(B * Ns, F), w1_f, b1_2d, wout_t, bout_t)  # (2, N)
        mu = out[0].reshape(B, Ns)
        sigma = out[1].reshape(B, Ns)
    else:
        out = _call_3d(e, w1_f, b1_2d, wout_t, bout_t)                       # (B, 2, Ns)
        mu = out[:, 0, :]
        sigma = out[:, 1, :]

    # torch .squeeze() on (B, Ns, 1) -> (B, Ns)   (B, Ns > 1 in this setup)
    return mu, sigma


def _init_linear(key, fan_in, fan_out):
    """PyTorch-style uniform(-1/sqrt(fan_in), 1/sqrt(fan_in)); weight stored (in, out)."""
    kw, kb = jax.random.split(key)
    bound = 1.0 / jnp.sqrt(jnp.float32(fan_in))
    w = jax.random.uniform(kw, (fan_in, fan_out), jnp.float32, -bound, bound)
    b = jax.random.uniform(kb, (fan_out,), jnp.float32, -bound, bound)
    return w, b


if __name__ == "__main__":
    key = jax.random.PRNGKey(0)
    k_e, k1, k2, k3 = jax.random.split(key, 4)

    # Small shapes consistent with AlphaLayer: e = FeatureExtractor output (B, Ns, 25)
    F, H = 25, 25
    w1, b1 = _init_linear(k1, F, H)   # linear_1: 25 -> H
    w2, b2 = _init_linear(k2, H, 1)   # linear_2: H -> 1          (mu head)
    w3, b3 = _init_linear(k3, H, 1)   # mapping_layer_sigma: H->1 (sigma head)

    def reference(e):
        B, Ns, _ = e.shape
        hi = jax.lax.Precision.HIGHEST
        h = jnp.dot(e.reshape(-1, F), w1, precision=hi) + b1
        h = jnp.maximum(h, NEG_SLOPE * h)
        mu_r = (jnp.dot(h, w2, precision=hi) + b2).reshape(B, Ns)
        sg_r = jnp.logaddexp(jnp.dot(h, w3, precision=hi) + b3, 0.0).reshape(B, Ns)
        return mu_r, sg_r

    # Exercise both paths: Ns % 8 != 0 (3-D BlockSpec) and Ns % 8 == 0 (flattened).
    for (B, Ns) in [(2, 4), (2, 8)]:
        e = jax.random.normal(jax.random.fold_in(k_e, Ns), (B, Ns, F), jnp.float32)
        mu, sigma = alpha_layer(e, w1, b1, w2, b2, w3, b3)
        jax.block_until_ready((mu, sigma))
        mu_ref, sigma_ref = reference(e)
        assert mu.shape == (B, Ns) and sigma.shape == (B, Ns)
        assert jnp.allclose(mu, mu_ref, atol=2e-4, rtol=2e-4)
        assert jnp.allclose(sigma, sigma_ref, atol=2e-4, rtol=2e-4)

    print("KERNEL_OK")
</pallas_src>

<mosaic_0001>
module attributes {stable_mosaic.version = 11 : i64} {
  func.func @alpha_kernel(%arg0: i32, %arg1: i32, %arg2: memref<1x4x25xf32, #tpu.memory_space<vmem>>, %arg3: memref<25x25xf32, #tpu.memory_space<vmem>>, %arg4: memref<1x25xf32, #tpu.memory_space<vmem>>, %arg5: memref<2x25xf32, #tpu.memory_space<vmem>>, %arg6: memref<2x1xf32, #tpu.memory_space<vmem>>, %arg7: memref<1x2x4xf32, #tpu.memory_space<vmem>>) attributes {dimension_semantics = [#tpu.dimension_semantics<parallel>, #tpu.dimension_semantics<parallel>], iteration_bounds = array<i64: 2, 1>, scalar_prefetch = 0 : i64, scratch_operands = 0 : i64, tpu.core_type = #tpu.core_type<tc>, window_params = [{transform_indices = @transform_0, window_bounds = array<i64: 1, 4, 25>}, {pipeline_mode = #tpu.pipeline_mode<synchronous>, transform_indices = @transform_1, window_bounds = array<i64: 25, 25>}, {pipeline_mode = #tpu.pipeline_mode<synchronous>, transform_indices = @transform_2, window_bounds = array<i64: 1, 25>}, {pipeline_mode = #tpu.pipeline_mode<synchronous>, transform_indices = @transform_3, window_bounds = array<i64: 2, 25>}, {pipeline_mode = #tpu.pipeline_mode<synchronous>, transform_indices = @transform_4, window_bounds = array<i64: 2, 1>}, {transform_indices = @transform_5, window_bounds = array<i64: 1, 2, 4>}]} {
    %c0 = arith.constant 0 : index
    %c0_0 = arith.constant 0 : index
    %c0_1 = arith.constant 0 : index
    %0 = vector.load %arg2[%c0, %c0_0, %c0_1] : memref<1x4x25xf32, #tpu.memory_space<vmem>>, vector<1x4x25xf32>
    %1 = vector.shape_cast %0 : vector<1x4x25xf32> to vector<4x25xf32>
    %c0_2 = arith.constant 0 : index
    %c0_3 = arith.constant 0 : index
    %2 = vector.load %arg3[%c0_2, %c0_3] : memref<25x25xf32, #tpu.memory_space<vmem>>, vector<25x25xf32>
    %cst = arith.constant dense<0.000000e+00> : vector<4x25xf32>
    %3 = tpu.matmul %1, %2, %cst {dimension_numbers = #tpu.dot_dimension_numbers<[1], [0], [0], [1], [0, 0, 1, 1], [], []>} : vector<4x25xf32>, vector<25x25xf32>, vector<4x25xf32> -> vector<4x25xf32>
    %c0_4 = arith.constant 0 : index
    %c0_5 = arith.constant 0 : index
    %4 = vector.load %arg4[%c0_4, %c0_5] : memref<1x25xf32, #tpu.memory_space<vmem>>, vector<1x25xf32>
    %5 = vector.broadcast %4 : vector<1x25xf32> to vector<4x25xf32>
    %6 = arith.addf %3, %5 : vector<4x25xf32>
    %cst_6 = arith.constant 0.00999999977 : f32
    %7 = vector.broadcast %cst_6 : f32 to vector<4x25xf32>
    %8 = arith.mulf %7, %6 : vector<4x25xf32>
    %9 = arith.maximumf %6, %8 : vector<4x25xf32>
    %c0_7 = arith.constant 0 : index
    %c0_8 = arith.constant 0 : index
    %10 = vector.load %arg5[%c0_7, %c0_8] : memref<2x25xf32, #tpu.memory_space<vmem>>, vector<2x25xf32>
    %cst_9 = arith.constant dense<0.000000e+00> : vector<2x4xf32>
    %11 = tpu.matmul %10, %9, %cst_9 {dimension_numbers = #tpu.dot_dimension_numbers<[1], [1], [0], [0], [0, 0, 1, 0], [], []>} : vector<2x25xf32>, vector<4x25xf32>, vector<2x4xf32> -> vector<2x4xf32>
    %c0_10 = arith.constant 0 : index
    %c0_11 = arith.constant 0 : index
    %12 = vector.load %arg6[%c0_10, %c0_11] : memref<2x1xf32, #tpu.memory_space<vmem>>, vector<2x1xf32>
    %13 = vector.broadcast %12 : vector<2x1xf32> to vector<2x4xf32>
    %14 = arith.addf %11, %13 : vector<2x4xf32>
    %15 = tpu.iota {dimensions = array<i32: 0>} : vector<2x4xi32>
    %c0_i32 = arith.constant 0 : i32
    %16 = vector.broadcast %c0_i32 : i32 to vector<2x4xi32>
    %17 = arith.cmpi eq, %15, %16 : vector<2x4xi32>
    %cst_12 = arith.constant 0.000000e+00 : f32
    %18 = vector.broadcast %cst_12 : f32 to vector<2x4xf32>
    %19 = arith.maximumf %14, %18 : vector<2x4xf32>
    %20 = vector.broadcast %cst_12 : f32 to vector<2x4xf32>
    %21 = arith.subf %14, %20 : vector<2x4xf32>
    %22 = arith.cmpf one, %21, %21 : vector<2x4xf32>
    %23 = vector.broadcast %cst_12 : f32 to vector<2x4xf32>
    %24 = arith.addf %14, %23 : vector<2x4xf32>
    %25 = math.absf %21 : vector<2x4xf32>
    %cst_13 = arith.constant 0.000000e+00 : f32
    %26 = vector.broadcast %cst_13 : f32 to vector<2x4xf32>
    %27 = arith.subf %26, %25 : vector<2x4xf32>
    %28 = math.exp %27 : vector<2x4xf32>
    %29 = math.log1p %28 : vector<2x4xf32>
    %30 = arith.addf %19, %29 : vector<2x4xf32>
    %31 = arith.select %22, %24, %30 : vector<2x4xi1>, vector<2x4xf32>
    %32 = arith.select %17, %14, %31 : vector<2x4xi1>, vector<2x4xf32>
    %c0_14 = arith.constant 0 : index
    %c0_15 = arith.constant 0 : index
    %c0_16 = arith.constant 0 : index
    %33 = vector.load %arg7[%c0_14, %c0_15, %c0_16] : memref<1x2x4xf32, #tpu.memory_space<vmem>>, vector<1x2x4xf32>
    %34 = vector.shape_cast %33 : vector<1x2x4xf32> to vector<2x4xf32>
    %35 = vector.shape_cast %32 : vector<2x4xf32> to vector<1x2x4xf32>
    tpu.vector_store %arg7[%c0_14, %c0_15, %c0_16], %35 {strides = array<i32>} : memref<1x2x4xf32, #tpu.memory_space<vmem>>, vector<1x2x4xf32>,
    return
  }
  func.func @transform_0(%arg0: i32, %arg1: i32) -> (i32, i32, i32) {
    %c0_i32 = arith.constant 0 : i32
    %c0_i32_0 = arith.constant 0 : i32
    return %arg0, %arg1, %c0_i32 : i32, i32, i32
  }
  func.func @transform_1(%arg0: i32, %arg1: i32) -> (i32, i32) {
    %c0_i32 = arith.constant 0 : i32
    %c0_i32_0 = arith.constant 0 : i32
    %c0_i32_1 = arith.constant 0 : i32
    return %c0_i32, %c0_i32_0 : i32, i32
  }
  func.func @transform_2(%arg0: i32, %arg1: i32) -> (i32, i32) {
    %c0_i32 = arith.constant 0 : i32
    %c0_i32_0 = arith.constant 0 : i32
    %c0_i32_1 = arith.constant 0 : i32
    return %c0_i32, %c0_i32_0 : i32, i32
  }
  func.func @transform_3(%arg0: i32, %arg1: i32) -> (i32, i32) {
    %c0_i32 = arith.constant 0 : i32
    %c0_i32_0 = arith.constant 0 : i32
    %c0_i32_1 = arith.constant 0 : i32
    return %c0_i32, %c0_i32_0 : i32, i32
  }
  func.func @transform_4(%arg0: i32, %arg1: i32) -> (i32, i32) {
    %c0_i32 = arith.constant 0 : i32
    %c0_i32_0 = arith.constant 0 : i32
    %c0_i32_1 = arith.constant 0 : i32
    return %c0_i32, %c0_i32_0 : i32, i32
  }
  func.func @transform_5(%arg0: i32, %arg1: i32) -> (i32, i32, i32) {
    %c0_i32 = arith.constant 0 : i32
    %c0_i32_0 = arith.constant 0 : i32
    return %arg0, %c0_i32, %arg1 : i32, i32, i32
  }
}

</mosaic_0001>

<bundles_post_ra>
// kernel: alpha_layer.1
= control target key start
LH: loop header
LB: loop body
LE: loop exit
PB: predicated region body
PF: predicated region fallthrough
CT: control target
= control target key end

     0   :  { %10 = vsyncpa [#allocation3], 0  ;;  %s739_s18 = smov 0   ;;  %s741_s19 = smov 0   ;;  %s828_s0 = inlined_call_operand.vmem [shape: f32[2,4,25], index: 0, kind: input, shape index: {}]   ;;  %s829_s1 = inlined_call_operand.hbm [shape: f32[25,25], index: 1, kind: input, shape index: {}]   ;;  %s830_s2 = inlined_call_operand.vmem [shape: f32[1,25], index: 2, kind: input, shape index: {}]   ;;  %s831_s3 = inlined_call_operand.vmem [shape: f32[2,25], index: 3, kind: input, shape index: {}]   ;;  %s832_s4 = inlined_call_operand.vmem [shape: f32[2,1], index: 4, kind: input, shape index: {}]   ;;  %s833_s5 = inlined_call_operand.vmem [shape: f32[2,2,4], index: 5, kind: output, shape index: {}]  }
   0x1   :  { %s743_s20 = smov 0  }
   0x2 LB: > { %s552_s21 = sadd.s32 4294967295, %s699_s20   ;;  %s28_s22 = sadd.s32 1, %s695_s19  ;;  %s699_s20 = sphi %s743_s20, %s16_s20   ;;  %s695_s19 = sphi %s741_s19, %s843_s19   ;;  %s691_s18 = sphi %s739_s18, %s842_s18  }
   0x3   : > { %p30_p0 = scmp.ge.s32.totalorder %s28_s22, 2  ;;  %p554_p1 = scmp.ge.s32.totalorder %s699_s20, 1 }
   0x4   : > { %p173_p2 = scmp.lt.s32.totalorder %s699_s20, 3  ;;  %p764_p4 = scmp.eq.s32.totalorder %s552_s21, 0 }
   0x5   : > { %s845_s22 = smov (%p30_p0, %s28_s22), 0  ;;  %s701_s25 = smov [#allocation2]  }
   0x6   : > { %p760_p3 = pnand %p554_p1, %p173_p2  ;;  %s185_s26 = sshll.u32 %s701_s25, 4  ;;  %s186_s26 = int_to_ptr.vmem [resolvable:$true] %s185_s26 }
   0x7   : > { %s838_s24 = scalar_select %p764_p4, 1, 0 }
   0x8   : > { %s837_s23 = scalar_select %p760_p3, 1, 0 }
   0x9   : > { %p602_p5 = pneg %p760_p3  ;;  %s645_s30 = scalar_lea.hbm %s829_s1, 512 }
   0xa   : > { %p646_p7 = scmp.ne.s32.totalorder %s829_s1, %s645_s30  ;;  %p652_p11 = scmp.lt.u32.totalorder %s645_s30, %s829_s1 }
   0xb   : > { %p772_p6 = pnand %p764_p4, %p602_p5 }
   0xd   : > { %p647_p8 = pneg %p772_p6 }
   0xf   : > { %p648_p9 = pnand %p647_p8, %p646_p7 }
  0x11   : > { %p649_p10 = pneg %p648_p9 }
  0x13   : > { %p654_p12 = pnand %p652_p11, %p649_p10 }
  0x15   : > { %657 = shalt.err (!%p654_p12)
}
  0x16   : > { %s658_s10 = scalar_lea.vmem %s186_s26, 512  ;;  %p666_p2 = scmp.lt.s32.totalorder %s186_s26, %s186_s26 }
  0x17   : > { %p659_p13 = scmp.ne.s32.totalorder %s186_s26, %s658_s10  ;;  %p667_p5 = scmp.lt.s32.totalorder %s658_s10, %s658_s10 }
  0x19   : > { %p661_p0 = pnand %p659_p13, %p647_p8  ;;  %p668_p4 = por %p667_p5, %p666_p2 }
  0x1b   : > { %p662_p1 = pneg %p661_p0 }
  0x1d   : > { %p669_p3 = pnand %p668_p4, %p662_p1 }
  0x1f   : > { %672 = shalt.err (!%p669_p3)
}
  0x20   : > { %s702_s11 = smov 128   ;;  %s703_s12 = smov 8  }
  0x21   : > { %605 = dma.hbm_to_vmem [thread:$0]  (!%p772_p6), %s829_s1, 512, %s186_s26, [#allocation3], %s702_s11, %s702_s11, %s703_s12  }
  0x22   : > { %p840_p7 = scmp.ne.s32.totalorder %s837_s23, 0 }
  0x23   : > { %p841_p9 = scmp.ne.s32.totalorder (!%p840_p7), %s838_s24, 0 }
  0x24   : > { %220 = sbr.rel (%p840_p7) target bundleno = 528 (0x210), region = 40 }
  0x2b   : > { %686 = dma.done.wait (%p841_p9), [#allocation3], 512  }
  0x2c   : > { %688 = vsyncadd (%p841_p9), [#allocation3], 4294966784  ;;  %v704_v0 = vmov 0.0|0.0   ;;  %p252_p3 = scmp.lt.s32.totalorder %s691_s18, 1  ;;  %vm705_vm0 = vmmov 0   ;;  %v706_v1 = vmov 0.0   ;;  %v441_v28 = vlaneseq }
  0x2d   : > { %591 = vmatprep.subr.bf16.mxu0 %v704_v0  ;;  %583 = vmatprep.mubr.msk.f32.mxu0 %vm705_vm0, %v706_v1  ;;  %v267_v2 = vld [vmem:[#allocation2] sm:$0xff]  ;;  %v268_v3 = vld [vmem:[#allocation2 + $0x8] sm:$0xff]  ;;  %v269_v4 = vld [vmem:[#allocation2 + $0x10] sm:$0xff]  ;;  %vm282_vm1 = vcmask 1040384   ;;  %vm707_vm2 = vmmov 1   ;;  %vm278_vm4 = vcmask 203776  }
  0x2e   : > { %586 = vmatprep.subr.mxu1 %v706_v1  ;;  %588 = vmatprep.mubr.msk.f32.mxu1 %vm705_vm0, %v706_v1  ;;  %s847_s18 = smov (!%p252_p3, %s691_s18), 1  ;;  %v592_v5 = vpack.c.bf16 %v268_v3, %v267_v2  ;;  %v270_v6 = vld [vmem:[#allocation2 + $0x18] sm:$0x1]  ;;  %vm596_vm3 = vmpackc.low %vm282_vm1, %vm707_vm2  ;;  %v359_v9 = vld [vmem:[%s832_s4] sm:$0x3]  ;;  %v708_v10 = vmov 0  }
  0x2f   : > { %s559_s15 = sshll.u32 %s847_s18, 2  ;;  %v595_v7 = vpack.c.bf16 %v270_v6, %v269_v4  ;;  %640 = vset.pattern.permute.xlu0 %v708_v10  ;;  %v561_v11 = vld [vmem:[%s830_s2] ss:$0 sm:$0xff]  ;;  %v442_v32 = vshrl.u32 %v441_v28, 7  ;;  %s560_s29 = sshll.u32 %s847_s18, 1  ;;  %vm463_vm8 = vcmask 25600  }
  0x30   : > { %593 = vmatpush3.bf16.msra.mxu0 %v592_v5  ;;  %s258_s21 = scalar_lea.vmem %s828_s0, %s559_s15  ;;  %362 = vperm.xlu0 %640, %v359_v9   ;;  %v358_v17 = vld [vmem:[%s831_s3] sm:$0x3]  ;;  %s265_s7 = scalar_lea.vmem %s833_s5, %s560_s29 }
  0x31   : > { %594 = vmatprep.subr.bf16.mxu0 %v704_v0  ;;  %v266_v8 = vld [vmem:[%s258_s21] sm:$0xf]  ;;  %vm443_vm6 = vcmp.eq.s32.totalorder %v442_v32, 0 }
  0x34   : > { %597 = vmatpush3.bf16.msk.msra.mxu0 %vm596_vm3, %v595_v7 }
  0x37   : > { %584 = vmatmul.mubr.msk.f32.vlgmr.msra.gmra.mrb[0].mxu0 %vm278_vm4, %v266_v8 }
  0xaf   : > { %v363_v18 = vpop.permute.xlu0 %362 }
 0x10a   : > { %v352_v12 = vpop.f32.mrb[0].mxu0 }
 0x10b   : > { %v353_v13 = vadd.f32 %v561_v11, %v352_v12  ;;  %v585_v14 = vpop.f32.mrb[1].mxu0 }
 0x10d   : > { %v356_v15 = vmul.f32 0.01, %v353_v13 }
 0x10f   : > { %v357_v16 = vmax.f32 %v353_v13, %v356_v15 }
 0x111   : > { %587 = vmatpush3.xpose.msk.msra.mxu1 %vm278_vm4, %v357_v16 }
 0x114   : > { %589 = vmatmul.mubr.msk.f32.vlgmr.msra.gmra.mrb[0].mxu1 %vm278_vm4, %v358_v17 }
 0x1e7   : > { %v437_v19 = vpop.f32.mrb[0].mxu1 }
 0x1e8   : > { %v438_v20 = vadd.f32 %v437_v19, %v363_v18  ;;  %v590_v21 = vpop.f32.mrb[1].mxu1 }
 0x1ea   : > { %v447_v22 = vand.u32 2147483647, %v438_v20  ;;  %v444_v35 = vmax.f32 %v438_v20, 0.0  ;;  %vm445_vm7 = vcmp.ne.f32.partialorder %v438_v20, %v438_v20 }
 0x1ec   : > { %v448_v23 = vsub.f32 0.0, %v447_v22 }
 0x1ee   : > { %v449_v24 = vmul.f32 1.442695, %v448_v23 }
 0x1f0   : > { %641 = vpow2.f32 %v449_v24 }
 0x1fa   : > { %v642_v25 = vpop.eup %641 }
 0x1fb   : > { %v451_v26 = vadd.f32 1.0, %v642_v25  ;;  %v454_v27 = vmul.f32 -0.5, %v642_v25  ;;  %v457_v30 = vand.u32 2147483647, %v642_v25 }
 0x1fd   : > { %643 = vlog2.f32 %v451_v26  ;;  %v455_v29 = vadd.f32 1.0, %v454_v27  ;;  %vm458_vm5 = vcmp.lt.f32.partialorder %v457_v30, 0.0004427343 }
 0x1ff   : > { %v456_v34 = vmul.f32 %v642_v25, %v455_v29 }
 0x207   : > { %v644_v31 = vpop.eup %643 }
 0x208   : > { %v453_v33 = vmul.f32 0.6931472, %v644_v31 }
 0x20a   : > { %v459_v36 = vsel %vm458_vm5, %v456_v34, %v453_v33 }
 0x20b   : > { %v460_v37 = vadd.f32 %v459_v36, %v444_v35 }
 0x20d   : > { %v461_v38 = vsel %vm445_vm7, %v438_v20, %v460_v37 }
 0x20e   : > { %v462_v39 = vsel %vm443_vm6, %v438_v20, %v461_v38 }
 0x20f   : > { %464 = vst.msk [vmem:[%s265_s7] sm:$0x3] %vm463_vm8, %v462_v39 }
 0x210 PF: > { %s16_s20 = sadd.s32 1, %s699_s20   ;;  %s842_s18 = smov %s695_s19 }
 0x211   : > { %p13_p4 = scmp.ge.s32.totalorder %s16_s20, 4   ;;  %s843_s19 = smov %s845_s22 }
 0x213   :  { %15 = sbr.rel (!%p13_p4) target bundleno = 2 (0x2), region = 75 }
 0x21a   :  { %490 = vsyncpa [#allocation3], 1 }
 0x21b   :  { %492 = vsyncpa [#allocation3 + $0x1], 1 }

</bundles_post_ra>
